<compile_context>
chip_gen: v7x
topology: tpu7x:2x2x1
jax: 0.10.0
libtpu: 0.0.40
codegen_flags: <defaults>
</compile_context>

<pallas_src>
from functools import partial

import jax
import jax.numpy as jnp
from jax import lax
from jax.experimental import pallas as pl
from jax.experimental.pallas import tpu as pltpu


_SQRT_2_OVER_PI = 0.7978845608028654
_GELU_C1 = _SQRT_2_OVER_PI                 # sqrt(2/pi)
_GELU_C2 = 0.044715 * _SQRT_2_OVER_PI      # 0.044715 * sqrt(2/pi)


def _gelu_tanh(x):
    # tanh-approx GELU with sqrt(2/pi) folded into the cubic coefficients
    # (one fewer VPU mul per element; tanh issues on the EUP slot).
    # TODO(synk): PyTorch F.gelu defaults to the exact erf form; the tanh
    # approximation agrees to ~2e-3 absolute.
    u = x * (_GELU_C1 + _GELU_C2 * x * x)
    return 0.5 * x * (1.0 + jnp.tanh(u))


def _fc_block_kernel(x_ref, g_ref, bta_ref, w1_ref, b1_ref, w2_ref, b2_ref, o_ref,
                     *, eps, inv_h, use_layernorm):
    # x_ref: (tile_n, H)        g/bta/b1/b2: (1, H) f32
    # w1/w2: (H, H) bf16 (MXU-native)        o_ref: (tile_n, H) in x.dtype
    x = x_ref[...].astype(jnp.float32)

    if use_layernorm:
        # One-pass statistics: sum(x) and sum(x*x) are independent XLU
        # reductions (no serial mean -> centered -> var chain).
        mean = jnp.sum(x, axis=-1, keepdims=True) * inv_h          # mul, not div
        msq = jnp.sum(x * x, axis=-1, keepdims=True) * inv_h
        var = jnp.maximum(msq - mean * mean, 0.0)                  # guard cancellation
        inv_std = lax.rsqrt(var + eps)                             # EUP rsqrt
        x = (x - mean) * (inv_std * g_ref[...]) + bta_ref[...]

    # bf16 operands, f32 accumulation -> native MXU path on v5e/v6e/v7x.
    h = jnp.dot(x.astype(jnp.bfloat16), w1_ref[...],
                preferred_element_type=jnp.float32) + b1_ref[...]
    h = _gelu_tanh(h)
    # TODO(synk): training-mode dropout (p > 0) not implemented; eval identity.
    y = jnp.dot(h.astype(jnp.bfloat16), w2_ref[...],
                preferred_element_type=jnp.float32) + b2_ref[...]

    o_ref[...] = y.astype(o_ref.dtype)


def _default_tile_n(n_rows, max_tile=512):
    # Big blocks amortize per-step pipeline overhead, but keep the grid >= 2
    # steps where possible so both v7x TensorCores get work.  Tile must be a
    # multiple of 8 (sublane).
    half = pl.cdiv(n_rows, 2)
    half = ((half + 7) // 8) * 8
    return int(max(8, min(max_tile, half)))


def fc_block_forward(x, gamma, beta, w1, b1, w2, b2, *,
                     norm="layer", eps=1e-5, tile_n=None):
    """Fused FCBlock forward.  x: (N, H); weights input-major: y = x @ W + b."""
    N, H = x.shape
    use_layernorm = (norm == "layer")
    if tile_n is None:
        tile_n = _default_tile_n(N)

    # No jnp.pad copy: Pallas masks the partial last block.  Safe because
    # every row is processed independently (no cross-row reduction), so the
    # garbage rows in the masked tail never reach a kept output row.
    n_blocks = pl.cdiv(N, tile_n)

    ln_g = gamma.reshape(1, H).astype(jnp.float32)
    ln_b = beta.reshape(1, H).astype(jnp.float32)
    bias1 = b1.reshape(1, H).astype(jnp.float32)
    bias2 = b2.reshape(1, H).astype(jnp.float32)

    kernel = partial(_fc_block_kernel, eps=eps, inv_h=1.0 / H,
                     use_layernorm=use_layernorm)

    out = pl.pallas_call(
        kernel,
        out_shape=jax.ShapeDtypeStruct((N, H), x.dtype),
        grid_spec=pltpu.PrefetchScalarGridSpec(
            num_scalar_prefetch=0,
            grid=(n_blocks,),
            in_specs=[
                pl.BlockSpec((tile_n, H), lambda i: (i, 0)),   # x tile (lane-dense)
                pl.BlockSpec((1, H), lambda i: (0, 0)),        # LN gamma (resident)
                pl.BlockSpec((1, H), lambda i: (0, 0)),        # LN beta  (resident)
                pl.BlockSpec((H, H), lambda i: (0, 0)),        # W1 bf16  (resident)
                pl.BlockSpec((1, H), lambda i: (0, 0)),        # b1       (resident)
                pl.BlockSpec((H, H), lambda i: (0, 0)),        # W2 bf16  (resident)
                pl.BlockSpec((1, H), lambda i: (0, 0)),        # b2       (resident)
            ],
            out_specs=pl.BlockSpec((tile_n, H), lambda i: (i, 0)),
        ),
        compiler_params=pltpu.CompilerParams(
            dimension_semantics=("parallel",)),
    )(x, ln_g, ln_b, w1.astype(jnp.bfloat16), bias1, w2.astype(jnp.bfloat16), bias2)

    return out


def fc_block_reference(x, gamma, beta, w1, b1, w2, b2, *, norm="layer", eps=1e-5):
    # Pure-JAX reference mirroring the kernel's numerics (f32 LN / GELU,
    # bf16 matmul operands with f32 accumulation, eval-mode dropout).
    h = x.astype(jnp.float32)
    if norm == "layer":
        mean = jnp.mean(h, axis=-1, keepdims=True)
        var = jnp.mean((h - mean) ** 2, axis=-1, keepdims=True)
        h = (h - mean) / jnp.sqrt(var + eps) * gamma[None, :] + beta[None, :]
    h = jnp.dot(h.astype(jnp.bfloat16), w1.astype(jnp.bfloat16),
                preferred_element_type=jnp.float32) + b1[None, :]
    h = _gelu_tanh(h)
    h = jnp.dot(h.astype(jnp.bfloat16), w2.astype(jnp.bfloat16),
                preferred_element_type=jnp.float32) + b2[None, :]
    return h


if __name__ == "__main__":
    hidden = 128   # hidden_channels: keeps the 128-lane axis fully dense
    N = 300        # deliberately NOT a tile multiple -> exercises masked last block

    key = jax.random.PRNGKey(0)
    ks = jax.random.split(key, 7)
    x = jax.random.normal(ks[0], (N, hidden), jnp.float32)
    gamma = 1.0 + 0.1 * jax.random.normal(ks[1], (hidden,), jnp.float32)
    beta = 0.1 * jax.random.normal(ks[2], (hidden,), jnp.float32)
    scale = 1.0 / jnp.sqrt(jnp.float32(hidden))
    w1 = jax.random.normal(ks[3], (hidden, hidden), jnp.float32) * scale
    b1 = 0.1 * jax.random.normal(ks[4], (hidden,), jnp.float32)
    w2 = jax.random.normal(ks[5], (hidden, hidden), jnp.float32) * scale
    b2 = 0.1 * jax.random.normal(ks[6], (hidden,), jnp.float32)

    out = fc_block_forward(x, gamma, beta, w1, b1, w2, b2, norm="layer")
    out = jax.block_until_ready(out)

    ref = fc_block_reference(x, gamma, beta, w1, b1, w2, b2, norm="layer")
    assert out.shape == (N, hidden) and out.dtype == x.dtype
    max_err = float(jnp.max(jnp.abs(out - ref)))
    assert jnp.allclose(out, ref, atol=2e-2, rtol=2e-2), \
        f"mismatch vs reference, max_err={max_err}"

    print("KERNEL_OK")
</pallas_src>

<mosaic_0001>
module attributes {stable_mosaic.version = 11 : i64} {
  func.func @_fc_block_kernel(%arg0: i32, %arg1: memref<152x128xf32, #tpu.memory_space<vmem>>, %arg2: memref<1x128xf32, #tpu.memory_space<vmem>>, %arg3: memref<1x128xf32, #tpu.memory_space<vmem>>, %arg4: memref<128x128xbf16, #tpu.memory_space<vmem>>, %arg5: memref<1x128xf32, #tpu.memory_space<vmem>>, %arg6: memref<128x128xbf16, #tpu.memory_space<vmem>>, %arg7: memref<1x128xf32, #tpu.memory_space<vmem>>, %arg8: memref<152x128xf32, #tpu.memory_space<vmem>>) attributes {dimension_semantics = [#tpu.dimension_semantics<parallel>], iteration_bounds = array<i64: 2>, scalar_prefetch = 0 : i64, scratch_operands = 0 : i64, tpu.core_type = #tpu.core_type<tc>, window_params = [{transform_indices = @transform_0, window_bounds = array<i64: 152, 128>}, {pipeline_mode = #tpu.pipeline_mode<synchronous>, transform_indices = @transform_1, window_bounds = array<i64: 1, 128>}, {pipeline_mode = #tpu.pipeline_mode<synchronous>, transform_indices = @transform_2, window_bounds = array<i64: 1, 128>}, {pipeline_mode = #tpu.pipeline_mode<synchronous>, transform_indices = @transform_3, window_bounds = array<i64: 128, 128>}, {pipeline_mode = #tpu.pipeline_mode<synchronous>, transform_indices = @transform_4, window_bounds = array<i64: 1, 128>}, {pipeline_mode = #tpu.pipeline_mode<synchronous>, transform_indices = @transform_5, window_bounds = array<i64: 128, 128>}, {pipeline_mode = #tpu.pipeline_mode<synchronous>, transform_indices = @transform_6, window_bounds = array<i64: 1, 128>}, {transform_indices = @transform_7, window_bounds = array<i64: 152, 128>}]} {
    %c0 = arith.constant 0 : index
    %c0_0 = arith.constant 0 : index
    %0 = vector.load %arg1[%c0, %c0_0] : memref<152x128xf32, #tpu.memory_space<vmem>>, vector<152x128xf32>
    %cst = arith.constant dense<0.000000e+00> : vector<152xf32>
    %1 = vector.multi_reduction <add>, %0, %cst [1] : vector<152x128xf32> to vector<152xf32>
    %2 = vector.shape_cast %1 : vector<152xf32> to vector<152x1xf32>
    %cst_1 = arith.constant 7.812500e-03 : f32
    %3 = vector.broadcast %cst_1 : f32 to vector<152x1xf32>
    %4 = arith.mulf %2, %3 : vector<152x1xf32>
    %5 = arith.mulf %0, %0 : vector<152x128xf32>
    %cst_2 = arith.constant dense<0.000000e+00> : vector<152xf32>
    %6 = vector.multi_reduction <add>, %5, %cst_2 [1] : vector<152x128xf32> to vector<152xf32>
    %7 = vector.shape_cast %6 : vector<152xf32> to vector<152x1xf32>
    %cst_3 = arith.constant 7.812500e-03 : f32
    %8 = vector.broadcast %cst_3 : f32 to vector<152x1xf32>
    %9 = arith.mulf %7, %8 : vector<152x1xf32>
    %10 = arith.mulf %4, %4 : vector<152x1xf32>
    %11 = arith.subf %9, %10 : vector<152x1xf32>
    %cst_4 = arith.constant 0.000000e+00 : f32
    %12 = vector.broadcast %cst_4 : f32 to vector<152x1xf32>
    %13 = arith.maximumf %11, %12 : vector<152x1xf32>
    %cst_5 = arith.constant 9.99999974E-6 : f32
    %14 = vector.broadcast %cst_5 : f32 to vector<152x1xf32>
    %15 = arith.addf %13, %14 : vector<152x1xf32>
    %16 = math.rsqrt %15 : vector<152x1xf32>
    %17 = vector.broadcast %4 : vector<152x1xf32> to vector<152x128xf32>
    %18 = arith.subf %0, %17 : vector<152x128xf32>
    %c0_6 = arith.constant 0 : index
    %c0_7 = arith.constant 0 : index
    %19 = vector.load %arg2[%c0_6, %c0_7] : memref<1x128xf32, #tpu.memory_space<vmem>>, vector<1x128xf32>
    %20 = vector.broadcast %16 : vector<152x1xf32> to vector<152x128xf32>
    %21 = vector.broadcast %19 : vector<1x128xf32> to vector<152x128xf32>
    %22 = arith.mulf %20, %21 : vector<152x128xf32>
    %23 = arith.mulf %18, %22 : vector<152x128xf32>
    %c0_8 = arith.constant 0 : index
    %c0_9 = arith.constant 0 : index
    %24 = vector.load %arg3[%c0_8, %c0_9] : memref<1x128xf32, #tpu.memory_space<vmem>>, vector<1x128xf32>
    %25 = vector.broadcast %24 : vector<1x128xf32> to vector<152x128xf32>
    %26 = arith.addf %23, %25 : vector<152x128xf32>
    %27 = arith.truncf %26 : vector<152x128xf32> to vector<152x128xbf16>
    %c0_10 = arith.constant 0 : index
    %c0_11 = arith.constant 0 : index
    %28 = vector.load %arg4[%c0_10, %c0_11] : memref<128x128xbf16, #tpu.memory_space<vmem>>, vector<128x128xbf16>
    %cst_12 = arith.constant dense<0.000000e+00> : vector<152x128xf32>
    %29 = tpu.matmul %27, %28, %cst_12 {dimension_numbers = #tpu.dot_dimension_numbers<[1], [0], [0], [1], [0, 0, 1, 1], [], []>} : vector<152x128xbf16>, vector<128x128xbf16>, vector<152x128xf32> -> vector<152x128xf32>
    %c0_13 = arith.constant 0 : index
    %c0_14 = arith.constant 0 : index
    %30 = vector.load %arg5[%c0_13, %c0_14] : memref<1x128xf32, #tpu.memory_space<vmem>>, vector<1x128xf32>
    %31 = vector.broadcast %30 : vector<1x128xf32> to vector<152x128xf32>
    %32 = arith.addf %29, %31 : vector<152x128xf32>
    %cst_15 = arith.constant 0.0356774069 : f32
    %33 = vector.broadcast %cst_15 : f32 to vector<152x128xf32>
    %34 = arith.mulf %33, %32 : vector<152x128xf32>
    %35 = arith.mulf %34, %32 : vector<152x128xf32>
    %cst_16 = arith.constant 0.797884583 : f32
    %36 = vector.broadcast %cst_16 : f32 to vector<152x128xf32>
    %37 = arith.addf %36, %35 : vector<152x128xf32>
    %38 = arith.mulf %32, %37 : vector<152x128xf32>
    %cst_17 = arith.constant 5.000000e-01 : f32
    %39 = vector.broadcast %cst_17 : f32 to vector<152x128xf32>
    %40 = arith.mulf %39, %32 : vector<152x128xf32>
    %41 = math.tanh %38 : vector<152x128xf32>
    %cst_18 = arith.constant 1.000000e+00 : f32
    %42 = vector.broadcast %cst_18 : f32 to vector<152x128xf32>
    %43 = arith.addf %42, %41 : vector<152x128xf32>
    %44 = arith.mulf %40, %43 : vector<152x128xf32>
    %45 = arith.truncf %44 : vector<152x128xf32> to vector<152x128xbf16>
    %c0_19 = arith.constant 0 : index
    %c0_20 = arith.constant 0 : index
    %46 = vector.load %arg6[%c0_19, %c0_20] : memref<128x128xbf16, #tpu.memory_space<vmem>>, vector<128x128xbf16>
    %cst_21 = arith.constant dense<0.000000e+00> : vector<152x128xf32>
    %47 = tpu.matmul %45, %46, %cst_21 {dimension_numbers = #tpu.dot_dimension_numbers<[1], [0], [0], [1], [0, 0, 1, 1], [], []>} : vector<152x128xbf16>, vector<128x128xbf16>, vector<152x128xf32> -> vector<152x128xf32>
    %c0_22 = arith.constant 0 : index
    %c0_23 = arith.constant 0 : index
    %48 = vector.load %arg7[%c0_22, %c0_23] : memref<1x128xf32, #tpu.memory_space<vmem>>, vector<1x128xf32>
    %49 = vector.broadcast %48 : vector<1x128xf32> to vector<152x128xf32>
    %50 = arith.addf %47, %49 : vector<152x128xf32>
    %c0_24 = arith.constant 0 : index
    %c0_25 = arith.constant 0 : index
    %51 = vector.load %arg8[%c0_24, %c0_25] : memref<152x128xf32, #tpu.memory_space<vmem>>, vector<152x128xf32>
    tpu.vector_store %arg8[%c0_24, %c0_25], %50 {strides = array<i32>} : memref<152x128xf32, #tpu.memory_space<vmem>>, vector<152x128xf32>,
    return
  }
  func.func @transform_0(%arg0: i32) -> (i32, i32) {
    %c0_i32 = arith.constant 0 : i32
    %c0_i32_0 = arith.constant 0 : i32
    return %arg0, %c0_i32 : i32, i32
  }
  func.func @transform_1(%arg0: i32) -> (i32, i32) {
    %c0_i32 = arith.constant 0 : i32
    %c0_i32_0 = arith.constant 0 : i32
    %c0_i32_1 = arith.constant 0 : i32
    return %c0_i32, %c0_i32_0 : i32, i32
  }
  func.func @transform_2(%arg0: i32) -> (i32, i32) {
    %c0_i32 = arith.constant 0 : i32
    %c0_i32_0 = arith.constant 0 : i32
    %c0_i32_1 = arith.constant 0 : i32
    return %c0_i32, %c0_i32_0 : i32, i32
  }
  func.func @transform_3(%arg0: i32) -> (i32, i32) {
    %c0_i32 = arith.constant 0 : i32
    %c0_i32_0 = arith.constant 0 : i32
    %c0_i32_1 = arith.constant 0 : i32
    return %c0_i32, %c0_i32_0 : i32, i32
  }
  func.func @transform_4(%arg0: i32) -> (i32, i32) {
    %c0_i32 = arith.constant 0 : i32
    %c0_i32_0 = arith.constant 0 : i32
    %c0_i32_1 = arith.constant 0 : i32
    return %c0_i32, %c0_i32_0 : i32, i32
  }
  func.func @transform_5(%arg0: i32) -> (i32, i32) {
    %c0_i32 = arith.constant 0 : i32
    %c0_i32_0 = arith.constant 0 : i32
    %c0_i32_1 = arith.constant 0 : i32
    return %c0_i32, %c0_i32_0 : i32, i32
  }
  func.func @transform_6(%arg0: i32) -> (i32, i32) {
    %c0_i32 = arith.constant 0 : i32
    %c0_i32_0 = arith.constant 0 : i32
    %c0_i32_1 = arith.constant 0 : i32
    return %c0_i32, %c0_i32_0 : i32, i32
  }
  func.func @transform_7(%arg0: i32) -> (i32, i32) {
    %c0_i32 = arith.constant 0 : i32
    %c0_i32_0 = arith.constant 0 : i32
    return %arg0, %c0_i32 : i32, i32
  }
}

</mosaic_0001>

<bundles_post_ra>
// kernel: tpu_custom_call.1
= control target key start
LH: loop header
LB: loop body
LE: loop exit
PB: predicated region body
PF: predicated region fallthrough
CT: control target
= control target key end

     0   :  { %s2478_s0 = inlined_call_operand.hbm [shape: f32[300,128], index: 0, kind: input, shape index: {}]   ;;  %s2479_s1 = inlined_call_operand.vmem [shape: f32[1,128], index: 1, kind: input, shape index: {}]   ;;  %s2480_s2 = inlined_call_operand.vmem [shape: f32[1,128], index: 2, kind: input, shape index: {}]   ;;  %s2481_s3 = inlined_call_operand.hbm [shape: bf16[128,128], index: 3, kind: input, shape index: {}]   ;;  %s2482_s4 = inlined_call_operand.vmem [shape: f32[1,128], index: 4, kind: input, shape index: {}]   ;;  %s2483_s5 = inlined_call_operand.hbm [shape: bf16[128,128], index: 5, kind: input, shape index: {}]   ;;  %s2484_s6 = inlined_call_operand.vmem [shape: f32[1,128], index: 6, kind: input, shape index: {}]   ;;  %s2485_s7 = inlined_call_operand.hbm [shape: f32[300,128], index: 7, kind: output, shape index: {}]  }
   0x1   :  { %2489 = sst [smem:[#allocation12_spill]] %s2481_s3 }
   0x2   :  { %12 = vsyncpa [#allocation3], 0 }
   0x3   :  { %14 = vsyncpa [#allocation3 + $0x1], 0 }
   0x4   :  { %15 = vsyncpa [#allocation6], 0 }
   0x5   :  { %16 = vsyncpa [#allocation4], 0 }
   0x6   :  { %18 = vsyncpa [#allocation4 + $0x1], 0  ;;  %s1846_s24 = smov 0   ;;  %s1848_s25 = smov 0  }
   0x7   :  { %s1850_s26 = smov 0   ;;  %s1852_s27 = smov 0  }
   0x8 LB: > { %s1867_s28 = sadd.s32 4294967295, %s1794_s27   ;;  %s1329_s29 = sadd.s32 4294967294, %s1794_s27   ;;  %s1794_s27 = sphi %s1852_s27, %s2507_s27   ;;  %s1790_s26 = sphi %s1850_s26, %s2506_s26   ;;  %s1786_s25 = sphi %s1848_s25, %s2505_s25   ;;  %s1782_s24 = sphi %s1846_s24, %s2504_s24  }
   0x9   : > { %p44_p0 = scmp.ne.s32.totalorder %s1786_s25, %s1782_s24  ;;  %p2486_p1 = scmp.eq.s32.totalorder %s1867_s28, 0 }
   0xa   : > { %p200_p3 = scmp.eq.s32.totalorder %s1329_s29, 1  ;;  %p1330_p5 = scmp.ge.s32.totalorder %s1794_s27, 1 }
   0xb   : > { %p1876_p4 = por %p2486_p1, %p44_p0  ;;  %p207_p7 = scmp.lt.s32.totalorder %s1794_s27, 3 }
   0xc   : > { %p1881_p6 = por %p200_p3, %p44_p0  ;;  %s1796_s10 = smov [#allocation5]  }
   0xd   : > { %s2490_s30 = scalar_select %p1876_p4, 1, 0 }
   0xe   : > { %s2491_s8 = scalar_select %p1881_p6, 1, 0 }
   0xf   : > { %p1886_p8 = pnand %p1330_p5, %p207_p7  ;;  %s225_s11 = sshll.u32 %s1796_s10, 4  ;;  %s1890_s11 = int_to_ptr.vmem [resolvable:$true] %s225_s11 }
  0x10   : > { %s1797_s13 = smov [#allocation7]   ;;  %s2494_s3 = sld [smem:[#allocation12_spill]] }
  0x11   : > { %p1485_p9 = pneg %p1886_p8  ;;  %s241_s14 = sshll.u32 %s1797_s13, 4  ;;  %s1901_s14 = int_to_ptr.vmem [resolvable:$true] %s241_s14 }
  0x13   : > { %p1897_p11 = pnand %p1485_p9, %p2486_p1 }
  0x15   : > { %p1640_p13 = pneg %p1897_p11 }
  0x16   : > { %s1638_s17 = scalar_lea.hbm %s2494_s3, 1024 }
  0x17   : > { %p1639_p12 = scmp.ne.s32.totalorder %s2494_s3, %s1638_s17  ;;  %p1645_p5 = scmp.lt.u32.totalorder %s1638_s17, %s2494_s3 }
  0x19   : > { %p1641_p0 = pnand %p1640_p13, %p1639_p12 }
  0x1b   : > { %p1642_p3 = pneg %p1641_p0 }
  0x1d   : > { %p1647_p7 = pnand %p1645_p5, %p1642_p3 }
  0x1f   : > { %1650 = shalt.err (!%p1647_p7)
}
  0x20   : > { %s1651_s22 = scalar_lea.vmem %s1890_s11, 1024  ;;  %p1659_p2 = scmp.lt.s32.totalorder %s1890_s11, %s1890_s11 }
  0x21   : > { %p1652_p9 = scmp.ne.s32.totalorder %s1890_s11, %s1651_s22  ;;  %p1660_p12 = scmp.lt.s32.totalorder %s1651_s22, %s1651_s22 }
  0x23   : > { %p1654_p10 = pnand %p1652_p9, %p1640_p13  ;;  %p1661_p0 = por %p1660_p12, %p1659_p2 }
  0x25   : > { %p1655_p1 = pneg %p1654_p10 }
  0x27   : > { %p1662_p6 = pnand %p1661_p0, %p1655_p1 }
  0x29   : > { %1665 = shalt.err (!%p1662_p6)
}
  0x2a   : > { %s1798_s23 = smov 64   ;;  %s1799_s29 = smov 4  }
  0x2b   : > { %1488 = dma.hbm_to_vmem [thread:$0]  (!%p1897_p11), %s2494_s3, 1024, %s1890_s11, [#allocation6], %s1798_s23, %s1798_s23, %s1799_s29  }
  0x2c   : > { %s1666_s17 = scalar_lea.hbm %s2483_s5, 1024 }
  0x2d   : > { %p1667_p2 = scmp.ne.s32.totalorder %s2483_s5, %s1666_s17  ;;  %p1673_p10 = scmp.lt.u32.totalorder %s1666_s17, %s2483_s5 }
  0x2f   : > { %p1669_p1 = pnand %p1667_p2, %p1640_p13 }
  0x31   : > { %p1670_p6 = pneg %p1669_p1 }
  0x33   : > { %p1675_p3 = pnand %p1673_p10, %p1670_p6 }
  0x35   : > { %1678 = shalt.err (!%p1675_p3)
}
  0x36   : > { %s1679_s11 = scalar_lea.vmem %s1901_s14, 1024  ;;  %p1687_p12 = scmp.lt.s32.totalorder %s1901_s14, %s1901_s14 }
  0x37   : > { %p1680_p5 = scmp.ne.s32.totalorder %s1901_s14, %s1679_s11  ;;  %p1688_p0 = scmp.lt.s32.totalorder %s1679_s11, %s1679_s11 }
  0x39   : > { %p1682_p7 = pnand %p1680_p5, %p1640_p13  ;;  %p1689_p2 = por %p1688_p0, %p1687_p12 }
  0x3b   : > { %p1683_p9 = pneg %p1682_p7 }
  0x3d   : > { %p1690_p1 = pnand %p1689_p2, %p1683_p9 }
  0x3f   : > { %1693 = shalt.err (!%p1690_p1)
}
  0x40   : > { %1491 = dma.hbm_to_vmem [thread:$0]  (!%p1897_p11), %s2483_s5, 1024, %s1901_s14, [#allocation6], %s1798_s23, %s1798_s23, %s1799_s29  }
  0x41   : > { %s1956_s13 = sadd.s32 1, %s1794_s27   ;;  %s31_s12 = sadd.s32 1, %s1790_s26 }
  0x42   : > { %s28_s15 = ssub.s32 %s1794_s27, %s1956_s13  ;;  %p38_p13 = scmp.ne.s32.totalorder %s1790_s26, %s1786_s25 }
  0x43   : > { %p29_p6 = scmp.eq.s32.totalorder %s28_s15, 0  ;;  %p39_p10 = scmp.eq.s32.totalorder %s1794_s27, 0 }
  0x44   : > { %p2495_p3 = scmp.eq.s32.totalorder %s1867_s28, 1  ;;  %p1502_p7 = scmp.lt.s32.totalorder %s1794_s27, 2 }
  0x45   : > { %s1972_s17 = scalar_select %p29_p6, %s1790_s26, %s31_s12  }
  0x46   : > { %p1966_p5 = por %p2495_p3, %p38_p13  ;;  %p40_p9 = por %p39_p10, %p38_p13 }
  0x47   : > { %s258_s18 = sand.u32 1, %s1790_s26   ;;  %s1361_s14 = smul.u32 2432, %s1794_s27 }
  0x48   : > { %s2496_s16 = scalar_select %p1966_p5, 1, 0 }
  0x49   : > { %s1471_s19 = smul.u32 152, %s258_s18  ;;  %p1976_p11 = pnand %p1502_p7, %p40_p9 }
  0x4a   : > { %s1983_s21 = scalar_lea.hbm %s2478_s0, %s1361_s14  ;;  %s1987_s10 = scalar_lea.sflag [#allocation3], %s258_s18 }
  0x4b   : > { %s262_s11 = scalar_lea.vmem [#allocation2], %s1471_s19  ;;  %s1694_s12 = scalar_lea.hbm %s1983_s21, 2432 }
  0x4c   : > { %s269_s22 = sshll.u32 %s262_s11, 4  ;;  %p1695_p12 = scmp.ne.s32.totalorder %s1983_s21, %s1694_s12  ;;  %s1985_s22 = int_to_ptr.vmem [resolvable:$true] %s269_s22 }
  0x4d   : > { %p1696_p0 = pneg %p1976_p11  ;;  %s1699_s29 = scalar_lea.hbm %s2478_s0, 4864 }
  0x4e   : > { %p1700_p13 = scmp.lt.u32.totalorder %s1983_s21, %s2478_s0  ;;  %p1701_p6 = scmp.lt.u32.totalorder %s1699_s29, %s1694_s12 }
  0x4f   : > { %p1697_p2 = pnand %p1696_p0, %p1695_p12  ;;  %p1703_p3 = scmp.lt.u32.totalorder %s1694_s12, %s1983_s21 }
  0x50   : > { %p1702_p10 = por %p1701_p6, %p1700_p13 }
  0x51   : > { %p1698_p1 = pneg %p1697_p2 }
  0x52   : > { %p1704_p7 = por %p1703_p3, %p1702_p10 }
  0x54   : > { %p1705_p9 = pnand %p1704_p7, %p1698_p1 }
  0x56   : > { %1708 = shalt.err (!%p1705_p9)
}
  0x57   : > { %s1709_s18 = scalar_lea.vmem %s1985_s22, 2432  ;;  %s1800_s19 = smov [#allocation2]  }
  0x58   : > { %p1710_p12 = scmp.ne.s32.totalorder %s1985_s22, %s1709_s18  ;;  %s1714_s11 = sshll.u32 %s1800_s19, 4  ;;  %s1715_s11 = int_to_ptr.vmem [resolvable:$false] %s1714_s11 }
  0x59   : > { %s1716_s3 = scalar_lea.vmem %s1715_s11, 4864  ;;  %p1717_p4 = scmp.lt.s32.totalorder %s1985_s22, %s1715_s11 }
  0x5a   : > { %p1712_p2 = pnand %p1710_p12, %p1696_p0  ;;  %p1718_p13 = scmp.lt.s32.totalorder %s1716_s3, %s1709_s18 }
  0x5c   : > { %p1713_p5 = pneg %p1712_p2  ;;  %p1719_p6 = por %p1718_p13, %p1717_p4 }
  0x5e   : > { %p1720_p10 = pnand %p1719_p6, %p1713_p5 }
  0x60   : > { %1723 = shalt.err (!%p1720_p10)
}
  0x61   : > { %s1801_s12 = smov 128   ;;  %s1802_s15 = smov 8  }
  0x62   : > { %1495 = dma.hbm_to_vmem [thread:$0]  (!%p1976_p11), %s1983_s21, 2432, %s1985_s22, %s1987_s10, %s1801_s12, %s1801_s12, %s1802_s15  }
  0x63   : > { %281 = sbr.rel (%p1886_p8) target bundleno = 829 (0x33d), region = 48  ;;  %s2018_s14 = sand.u32 (!%p1886_p8), 1, %s1786_s25  }
  0x64   : > { %s1472_s29 = smul.u32 (!%p1886_p8), 152, %s2018_s14  ;;  %s284_s20 = scalar_lea.sflag (!%p1886_p8), [#allocation3], %s2018_s14 }
  0x65   : > { %p2498_p4 = scmp.ne.s32.totalorder (!%p1886_p8), %s2490_s30, 0 }
  0x66   : > { %s2024_s18 = scalar_lea.vmem (!%p1886_p8), [#allocation2], %s1472_s29 }
  0x6a   : > { %1769 = dma.done.wait (%p2498_p4), %s284_s20, 2432  }
  0x6b   : > { %1771 = vsyncadd (%p2498_p4), %s284_s20, 4294964864  ;;  %p2499_p5 = scmp.eq.s32.totalorder %s1867_s28, 0 }
  0x6d   : > { %1773 = dma.done.wait (%p2499_p5), [#allocation6], 2048   ;;  %p2500_p8 = pmov %p2499_p5 }
  0x6e   : > { %v2035_v0 = vld [vmem:[%s2024_s18 + $0x10] sm:$0xff]  ;;  %v2038_v1 = vld [vmem:[%s2024_s18] sm:$0xff]  ;;  %v2043_v2 = vld [vmem:[%s2024_s18 + $0x18] sm:$0xff]  ;;  %s2406_s3 = scalar_lea.vmem [#allocation8], %s1472_s29  ;;  %s1362_s12 = smul.u32 2432, %s1867_s28 }
  0x6f   : > { %1775 = vsyncadd (%p2500_p8), [#allocation6], 4294965248  ;;  %352 = vadd.xlane.f32.xlu1 %v2035_v0  ;;  %348 = vadd.xlane.f32.xlu0 %v2038_v1  ;;  %v2046_v3 = vld [vmem:[%s2024_s18 + $0x8] sm:$0xff]  ;;  %v405_v5 = vmul.f32 %v2038_v1, %v2038_v1  ;;  %v408_v6 = vmul.f32 %v2043_v2, %v2043_v2  ;;  %v407_v7 = vmul.f32 %v2035_v0, %v2035_v0  ;;  %v2062_v9 = vld [vmem:[%s2024_s18 + $0x20] sm:$0xff]  ;;  %s1237_s15 = sshll.u32 %s2406_s3, 4  ;;  %s1224_s28 = scalar_lea.sflag [#allocation4], %s2018_s14  ;;  %s2433_s15 = int_to_ptr.vmem [resolvable:$true] %s1237_s15 }
  0x70   : > { %v406_v4 = vmul.f32 %v2046_v3, %v2046_v3  ;;  %v2059_v8 = vld [vmem:[%s2024_s18 + $0x28] sm:$0xff]  ;;  %v2067_v10 = vld [vmem:[%s2024_s18 + $0x38] sm:$0xff]  ;;  %v2070_v11 = vld [vmem:[%s2024_s18 + $0x30] sm:$0xff]  ;;  %v409_v14 = vmul.f32 %v2062_v9, %v2062_v9  ;;  %s1724_s30 = scalar_lea.vmem %s2433_s15, 2432  ;;  %p2501_p0 = scmp.ne.s32.totalorder %s2496_s16, 0 }
  0x71   : > { %v1546_v12 = vld [vmem:[#allocation5] sm:$0xff]   ;;  %v410_v13 = vmul.f32 %v2059_v8, %v2059_v8  ;;  %v412_v15 = vmul.f32 %v2067_v10, %v2067_v10  ;;  %v411_v16 = vmul.f32 %v2070_v11, %v2070_v11  ;;  %v1547_v17 = vld [vmem:[#allocation5 + $0x8] sm:$0xff]   ;;  %v1548_v18 = vld [vmem:[#allocation5 + $0x10] sm:$0xff]   ;;  %p1725_p11 = scmp.ne.s32.totalorder %s2433_s15, %s1724_s30  ;;  %s1803_s9 = smov [#allocation8]  }
  0x72   : > { %1399 = vmatprep.subr.bf16.mxu0 %v1546_v12  ;;  %v2083_v19 = vld [vmem:[%s2024_s18 + $0x48] sm:$0xff]  ;;  %v2086_v20 = vld [vmem:[%s2024_s18 + $0x40] sm:$0xff]  ;;  %v2091_v22 = vld [vmem:[%s2024_s18 + $0x58] sm:$0xff]  ;;  %s1728_s23 = sshll.u32 %s1803_s9, 4  ;;  %s1729_s23 = int_to_ptr.vmem [resolvable:$false] %s1728_s23 }
  0x73   : > { %354 = vadd.xlane.f32.xlu1 %v2043_v2  ;;  %350 = vadd.xlane.f32.xlu0 %v2046_v3  ;;  %v1549_v21 = vld [vmem:[#allocation5 + $0x18] sm:$0xff]   ;;  %v414_v24 = vmul.f32 %v2083_v19, %v2083_v19  ;;  %v413_v25 = vmul.f32 %v2086_v20, %v2086_v20  ;;  %v1550_v26 = vld [vmem:[#allocation5 + $0x20] sm:$0xff]   ;;  %v416_v27 = vmul.f32 %v2091_v22, %v2091_v22  ;;  %v1551_v29 = vld [vmem:[#allocation5 + $0x28] sm:$0xff]   ;;  %p1726_p1 = pnand %p1725_p11, %p2501_p0  ;;  %s1730_s21 = scalar_lea.vmem %s1729_s23, 4864 }
  0x74   : > { %1400 = vmatpush3.bf16.msra.mxu0 %v1546_v12  ;;  %v2094_v23 = vld [vmem:[%s2024_s18 + $0x50] sm:$0xff]  ;;  %v1552_v30 = vld [vmem:[#allocation5 + $0x30] sm:$0xff]   ;;  %v2115_v34 = vld [vmem:[%s2024_s18 + $0x78] sm:$0xff]  ;;  %p1731_p7 = scmp.lt.s32.totalorder %s2433_s15, %s1729_s23  ;;  %p1732_p9 = scmp.lt.s32.totalorder %s1730_s21, %s1724_s30 }
  0x75   : > { %1401 = vmatprep.subr.bf16.mxu0 %v1547_v17  ;;  %v415_v28 = vmul.f32 %v2094_v23, %v2094_v23  ;;  %v2107_v31 = vld [vmem:[%s2024_s18 + $0x68] sm:$0xff]  ;;  %v2110_v32 = vld [vmem:[%s2024_s18 + $0x60] sm:$0xff]  ;;  %v2118_v35 = vld [vmem:[%s2024_s18 + $0x70] sm:$0xff]  ;;  %v420_v38 = vmul.f32 %v2115_v34, %v2115_v34  ;;  %p1727_p3 = pneg %p1726_p1 }
  0x76   : > { %v1553_v33 = vld [vmem:[#allocation5 + $0x38] sm:$0xff]   ;;  %v418_v36 = vmul.f32 %v2107_v31, %v2107_v31  ;;  %v417_v37 = vmul.f32 %v2110_v32, %v2110_v32  ;;  %v419_v39 = vmul.f32 %v2118_v35, %v2118_v35  ;;  %v2134_v41 = vld [vmem:[%s2024_s18 + $0x80] sm:$0xff]  ;;  %p1733_p12 = por %p1732_p9, %p1731_p7 }
  0x77   : > { %426 = vadd.xlane.f32.xlu1 %v406_v4  ;;  %424 = vadd.xlane.f32.xlu0 %v405_v5  ;;  %v2131_v40 = vld [vmem:[%s2024_s18 + $0x88] sm:$0xff]  ;;  %v421_v42 = vmul.f32 %v2134_v41, %v2134_v41  ;;  %v2141_v43 = vld [vmem:[%s2024_s18 + $0x90] sm:$0xff]  ;;  %s2430_s18 = scalar_lea.hbm %s2485_s7, %s1362_s12 }
  0x78   : > { %1402 = vmatpush3.bf16.msra.mxu0 %v1547_v17  ;;  %v423_v44 = vmul.f32 %v2141_v43, %v2141_v43  ;;  %v422_v45 = vmul.f32 %v2131_v40, %v2131_v40  ;;  %p1734_p2 = pnand %p1733_p12, %p1727_p3 }
  0x79   : > { %1403 = vmatprep.subr.bf16.mxu0 %v1548_v18 }
  0x7b   : > { %430 = vadd.xlane.f32.xlu1 %v408_v6  ;;  %428 = vadd.xlane.f32.xlu0 %v407_v7 }
  0x7c   : > { %1404 = vmatpush3.bf16.msra.mxu0 %v1548_v18 }
  0x7d   : > { %1405 = vmatprep.subr.bf16.mxu0 %v1549_v21 }
  0x7f   : > { %358 = vadd.xlane.f32.xlu1 %v2059_v8  ;;  %356 = vadd.xlane.f32.xlu0 %v2062_v9 }
  0x80   : > { %1406 = vmatpush3.bf16.msra.mxu0 %v1549_v21 }
  0x81   : > { %1407 = vmatprep.subr.bf16.mxu0 %v1550_v26 }
  0x83   : > { %362 = vadd.xlane.f32.xlu1 %v2067_v10  ;;  %360 = vadd.xlane.f32.xlu0 %v2070_v11 }
  0x84   : > { %1408 = vmatpush3.bf16.msra.mxu0 %v1550_v26 }
  0x85   : > { %1409 = vmatprep.subr.bf16.mxu0 %v1551_v29 }
  0x87   : > { %434 = vadd.xlane.f32.xlu1 %v410_v13  ;;  %432 = vadd.xlane.f32.xlu0 %v409_v14 }
  0x88   : > { %1410 = vmatpush3.bf16.msra.mxu0 %v1551_v29 }
  0x89   : > { %1411 = vmatprep.subr.bf16.mxu0 %v1552_v30 }
  0x8b   : > { %438 = vadd.xlane.f32.xlu1 %v412_v15  ;;  %436 = vadd.xlane.f32.xlu0 %v411_v16 }
  0x8c   : > { %1412 = vmatpush3.bf16.msra.mxu0 %v1552_v30 }
  0x8d   : > { %1413 = vmatprep.subr.bf16.mxu0 %v1553_v33 }
  0x8f   : > { %366 = vadd.xlane.f32.xlu1 %v2083_v19  ;;  %364 = vadd.xlane.f32.xlu0 %v2086_v20 }
  0x90   : > { %1414 = vmatpush3.bf16.msra.mxu0 %v1553_v33 }
  0x93   : > { %370 = vadd.xlane.f32.xlu1 %v2091_v22  ;;  %368 = vadd.xlane.f32.xlu0 %v2094_v23 }
  0x97   : > { %442 = vadd.xlane.f32.xlu1 %v414_v24  ;;  %440 = vadd.xlane.f32.xlu0 %v413_v25 }
  0x9b   : > { %446 = vadd.xlane.f32.xlu1 %v416_v27  ;;  %444 = vadd.xlane.f32.xlu0 %v415_v28 }
  0x9f   : > { %374 = vadd.xlane.f32.xlu1 %v2107_v31  ;;  %372 = vadd.xlane.f32.xlu0 %v2110_v32 }
  0xa3   : > { %378 = vadd.xlane.f32.xlu1 %v2115_v34  ;;  %376 = vadd.xlane.f32.xlu0 %v2118_v35 }
  0xa7   : > { %450 = vadd.xlane.f32.xlu1 %v418_v36  ;;  %448 = vadd.xlane.f32.xlu0 %v417_v37 }
  0xab   : > { %454 = vadd.xlane.f32.xlu1 %v420_v38  ;;  %452 = vadd.xlane.f32.xlu0 %v419_v39 }
  0xaf   : > { %382 = vadd.xlane.f32.xlu1 %v2131_v40  ;;  %380 = vadd.xlane.f32.xlu0 %v2134_v41 }
  0xb3   : > { %456 = vadd.xlane.f32.xlu1 %v421_v42  ;;  %384 = vadd.xlane.f32.xlu0 %v2141_v43 }
  0xb7   : > { %460 = vadd.xlane.f32.xlu1 %v423_v44  ;;  %458 = vadd.xlane.f32.xlu0 %v422_v45 }
  0xfc   : > { %v353_v46 = vpop.xlane.xlu1 %352  ;;  %v349_v47 = vpop.xlane.xlu0 %348 }
  0xfd   : > { %v2148_v50 = vmul.f32 0.0078125, %v349_v47  ;;  %v2152_v52 = vmul.f32 0.0078125, %v353_v46  ;;  %v2179_v47 = vld [vmem:[%s2479_s1] ss:$0 sm:$0xff] }
  0xff   : > { %v481_v56 = vmul.f32 %v2148_v50, %v2148_v50  ;;  %v483_v62 = vmul.f32 %v2152_v52, %v2152_v52 }
 0x100   : > { %v355_v48 = vpop.xlane.xlu1 %354  ;;  %v351_v49 = vpop.xlane.xlu0 %350 }
 0x101   : > { %v2150_v51 = vmul.f32 0.0078125, %v351_v49  ;;  %v2154_v53 = vmul.f32 0.0078125, %v355_v48 }
 0x103   : > { %v482_v57 = vmul.f32 %v2150_v51, %v2150_v51  ;;  %v484_v63 = vmul.f32 %v2154_v53, %v2154_v53 }
 0x104   : > { %v427_v54 = vpop.xlane.xlu1 %426  ;;  %v425_v55 = vpop.xlane.xlu0 %424 }
 0x105   : > { %v463_v58 = vmul.f32 0.0078125, %v427_v54  ;;  %v462_v59 = vmul.f32 0.0078125, %v425_v55 }
 0x107   : > { %v501_v60 = vsub.f32 %v463_v58, %v482_v57  ;;  %v500_v61 = vsub.f32 %v462_v59, %v481_v56  ;;  %v577_v56 = vsub.f32 %v2046_v3, %v2150_v51  ;;  %v576_v3 = vsub.f32 %v2038_v1, %v2148_v50 }
 0x108   : > { %v431_v4 = vpop.xlane.xlu1 %430  ;;  %v429_v5 = vpop.xlane.xlu0 %428  ;;  %v578_v1 = vsub.f32 %v2035_v0, %v2152_v52 }
 0x109   : > { %v520_v6 = vmax.f32 %v501_v60, 0.0  ;;  %v519_v7 = vmax.f32 %v500_v61, 0.0  ;;  %v465_v12 = vmul.f32 0.0078125, %v431_v4  ;;  %v464_v13 = vmul.f32 0.0078125, %v429_v5 }
 0x10b   : > { %v539_v14 = vadd.f32 1e-05, %v520_v6  ;;  %v538_v15 = vadd.f32 1e-05, %v519_v7  ;;  %v503_v16 = vsub.f32 %v465_v12, %v484_v63  ;;  %v502_v17 = vsub.f32 %v464_v13, %v483_v62  ;;  %v2191_v6 = vld [vmem:[%s2480_s2] ss:$0 sm:$0xff] }
 0x10c   : > { %v359_v18 = vpop.xlane.xlu1 %358  ;;  %v357_v21 = vpop.xlane.xlu0 %356 }
 0x10d   : > { %1562 = vrsqrt.f32 %v539_v14  ;;  %v522_v24 = vmax.f32 %v503_v16, 0.0  ;;  %v521_v25 = vmax.f32 %v502_v17, 0.0  ;;  %v2164_v30 = vmul.f32 0.0078125, %v359_v18 }
 0x10e   : > { %1564 = vrsqrt.f32 %v538_v15  ;;  %v2166_v33 = vmul.f32 0.0078125, %v357_v21 }
 0x10f   : > { %v541_v26 = vadd.f32 1e-05, %v522_v24  ;;  %v540_v27 = vadd.f32 1e-05, %v521_v25  ;;  %v486_v42 = vmul.f32 %v2164_v30, %v2164_v30 }
 0x110   : > { %v363_v28 = vpop.xlane.xlu1 %362  ;;  %v361_v29 = vpop.xlane.xlu0 %360  ;;  %v485_v44 = vmul.f32 %v2166_v33, %v2166_v33 }
 0x111   : > { %1566 = vrsqrt.f32 %v541_v26  ;;  %v2168_v36 = vmul.f32 0.0078125, %v363_v28  ;;  %v2170_v37 = vmul.f32 0.0078125, %v361_v29 }
 0x112   : > { %1568 = vrsqrt.f32 %v540_v27 }
 0x113   : > { %v488_v57 = vmul.f32 %v2168_v36, %v2168_v36  ;;  %v487_v58 = vmul.f32 %v2170_v37, %v2170_v37 }
 0x114   : > { %v435_v38 = vpop.xlane.xlu1 %434  ;;  %v433_v39 = vpop.xlane.xlu0 %432 }
 0x115   : > { %v467_v45 = vmul.f32 0.0078125, %v435_v38  ;;  %v466_v46 = vmul.f32 0.0078125, %v433_v39  ;;  %v579_v38 = vsub.f32 %v2043_v2, %v2154_v53 }
 0x117   : > { %v1563_v48 = vpop.eup %1562  ;;  %v505_v49 = vsub.f32 %v467_v45, %v486_v42  ;;  %v504_v54 = vsub.f32 %v466_v46, %v485_v44 }
 0x118   : > { %v1565_v55 = vpop.eup %1564  ;;  %v439_v59 = vpop.xlane.xlu1 %438  ;;  %v603_v61 = vmul.f32 %v1563_v48, %v2179_v47 }
 0x119   : > { %v437_v60 = vpop.xlane.xlu0 %436  ;;  %v524_v62 = vmax.f32 %v505_v49, 0.0  ;;  %v523_v63 = vmax.f32 %v504_v54, 0.0  ;;  %v469_v4 = vmul.f32 0.0078125, %v439_v59  ;;  %v602_v51 = vmul.f32 %v1565_v55, %v2179_v47 }
 0x11a   : > { %v468_v5 = vmul.f32 0.0078125, %v437_v60  ;;  %v622_v7 = vmul.f32 %v603_v61, %v577_v56 }
 0x11b   : > { %v1567_v12 = vpop.eup %1566  ;;  %v543_v13 = vadd.f32 1e-05, %v524_v62  ;;  %v542_v14 = vadd.f32 1e-05, %v523_v63  ;;  %v507_v15 = vsub.f32 %v469_v4, %v488_v57  ;;  %v621_v24 = vmul.f32 %v602_v51, %v576_v3 }
 0x11c   : > { %v506_v16 = vsub.f32 %v468_v5, %v487_v58  ;;  %v1569_v17 = vpop.eup %1568  ;;  %v367_v18 = vpop.xlane.xlu1 %366  ;;  %v648_v25 = vadd.f32 %v2191_v6, %v622_v7  ;;  %v605_v28 = vmul.f32 %v1567_v12, %v2179_v47  ;;  %v581_v51 = vsub.f32 %v2059_v8, %v2164_v30 }
 0x11d   : > { %v365_v21 = vpop.xlane.xlu0 %364  ;;  %1570 = vrsqrt.f32 %v543_v13  ;;  %v526_v26 = vmax.f32 %v507_v15, 0.0  ;;  %v647_v50 = vadd.f32 %v2191_v6, %v621_v24  ;;  %v604_v29 = vmul.f32 %v1569_v17, %v2179_v47 }
 0x11e   : > { %v525_v27 = vmax.f32 %v506_v16, 0.0  ;;  %1572 = vrsqrt.f32 %v542_v14  ;;  %v2204_v49 = vmul.f32 0.0078125, %v367_v18  ;;  %v2206_v54 = vmul.f32 0.0078125, %v365_v21 }
 0x11f   : > { %v545_v39 = vadd.f32 1e-05, %v526_v26  ;;  %v666_v45 = vpack.c.bf16 %v648_v25, %v647_v50  ;;  %v623_v48 = vmul.f32 %v604_v29, %v578_v1  ;;  %v624_v0 = vmul.f32 %v605_v28, %v579_v38 }
 0x120   : > { %v544_v42 = vadd.f32 1e-05, %v525_v27  ;;  %v371_v44 = vpop.xlane.xlu1 %370  ;;  %v490_v58 = vmul.f32 %v2204_v49, %v2204_v49  ;;  %v489_v59 = vmul.f32 %v2206_v54, %v2206_v54  ;;  %v580_v24 = vsub.f32 %v2062_v9, %v2166_v33 }
 0x121   : > { %v369_v46 = vpop.xlane.xlu0 %368  ;;  %1574 = vrsqrt.f32 %v545_v39  ;;  %1415 = vmatprep.mubr.bf16.mxu0 %v666_v45  ;;  %v649_v52 = vadd.f32 %v2191_v6, %v623_v48  ;;  %v2209_v55 = vmul.f32 0.0078125, %v371_v44  ;;  %v650_v53 = vadd.f32 %v2191_v6, %v624_v0 }
 0x122   : > { %1576 = vrsqrt.f32 %v544_v42  ;;  %v2211_v56 = vmul.f32 0.0078125, %v369_v46  ;;  %v582_v9 = vsub.f32 %v2070_v11, %v2170_v37  ;;  %v583_v0 = vsub.f32 %v2067_v10, %v2168_v36 }
 0x123   : > { %v667_v62 = vpack.c.bf16 %v650_v53, %v649_v52  ;;  %v492_v7 = vmul.f32 %v2209_v55, %v2209_v55 }
 0x124   : > { %v443_v2 = vpop.xlane.xlu1 %442  ;;  %v491_v12 = vmul.f32 %v2211_v56, %v2211_v56 }
 0x125   : > { %v441_v57 = vpop.xlane.xlu0 %440  ;;  %v471_v60 = vmul.f32 0.0078125, %v443_v2  ;;  %1416 = vmatmul.mubr.bf16.vlgmr.msra.gmra.mrb[0].mxu0 %v667_v62 }
 0x126   : > { %v470_v61 = vmul.f32 0.0078125, %v441_v57 }
 0x127   : > { %v1571_v63 = vpop.eup %1570  ;;  %v509_v4 = vsub.f32 %v471_v60, %v490_v58 }
 0x128   : > { %v508_v5 = vsub.f32 %v470_v61, %v489_v59  ;;  %v1573_v3 = vpop.eup %1572  ;;  %v447_v13 = vpop.xlane.xlu1 %446  ;;  %v607_v15 = vmul.f32 %v1571_v63, %v2179_v47 }
 0x129   : > { %v445_v14 = vpop.xlane.xlu0 %444  ;;  %v528_v16 = vmax.f32 %v509_v4, 0.0  ;;  %v473_v18 = vmul.f32 0.0078125, %v447_v13  ;;  %v606_v8 = vmul.f32 %v1573_v3, %v2179_v47 }
 0x12a   : > { %v527_v17 = vmax.f32 %v508_v5, 0.0  ;;  %v472_v21 = vmul.f32 0.0078125, %v445_v14  ;;  %v626_v30 = vmul.f32 %v607_v15, %v581_v51 }
 0x12b   : > { %v1575_v25 = vpop.eup %1574  ;;  %v547_v26 = vadd.f32 1e-05, %v528_v16  ;;  %v511_v28 = vsub.f32 %v473_v18, %v492_v7  ;;  %v625_v39 = vmul.f32 %v606_v8, %v580_v24 }
 0x12c   : > { %v546_v27 = vadd.f32 1e-05, %v527_v17  ;;  %v510_v1 = vsub.f32 %v472_v21, %v491_v12  ;;  %v1577_v50 = vpop.eup %1576  ;;  %v375_v29 = vpop.xlane.xlu1 %374  ;;  %v652_v42 = vadd.f32 %v2191_v6, %v626_v30  ;;  %v609_v46 = vmul.f32 %v1575_v25, %v2179_v47 }
 0x12d   : > { %v373_v38 = vpop.xlane.xlu0 %372  ;;  %1578 = vrsqrt.f32 %v547_v26  ;;  %v530_v44 = vmax.f32 %v511_v28, 0.0  ;;  %v651_v33 = vadd.f32 %v2191_v6, %v625_v39  ;;  %v608_v48 = vmul.f32 %v1577_v50, %v2179_v47 }
 0x12e   : > { %v529_v45 = vmax.f32 %v510_v1, 0.0  ;;  %1580 = vrsqrt.f32 %v546_v27  ;;  %v2236_v60 = vmul.f32 0.0078125, %v375_v29  ;;  %v2238_v61 = vmul.f32 0.0078125, %v373_v38 }
 0x12f   : > { %v549_v52 = vadd.f32 1e-05, %v530_v44  ;;  %v668_v57 = vpack.c.bf16 %v652_v42, %v651_v33  ;;  %v627_v59 = vmul.f32 %v608_v48, %v582_v9  ;;  %v628_v11 = vmul.f32 %v609_v46, %v583_v0 }
 0x130   : > { %v548_v2 = vadd.f32 1e-05, %v529_v45  ;;  %v379_v53 = vpop.xlane.xlu1 %378  ;;  %v494_v5 = vmul.f32 %v2236_v60, %v2236_v60  ;;  %v493_v3 = vmul.f32 %v2238_v61, %v2238_v61  ;;  %v585_v17 = vsub.f32 %v2083_v19, %v2204_v49 }
 0x131   : > { %v377_v58 = vpop.xlane.xlu0 %376  ;;  %1582 = vrsqrt.f32 %v549_v52  ;;  %1419 = vmatprep.mubr.bf16.mxu0 %v668_v57  ;;  %v653_v37 = vadd.f32 %v2191_v6, %v627_v59  ;;  %v2241_v62 = vmul.f32 0.0078125, %v379_v53  ;;  %v654_v36 = vadd.f32 %v2191_v6, %v628_v11 }
 0x132   : > { %1584 = vrsqrt.f32 %v548_v2  ;;  %v2243_v63 = vmul.f32 0.0078125, %v377_v58  ;;  %v584_v1 = vsub.f32 %v2086_v20, %v2206_v54  ;;  %v586_v45 = vsub.f32 %v2094_v23, %v2211_v56 }
 0x133   : > { %v669_v12 = vpack.c.bf16 %v654_v36, %v653_v37  ;;  %v496_v18 = vmul.f32 %v2241_v62, %v2241_v62  ;;  %v587_v23 = vsub.f32 %v2091_v22, %v2209_v55 }
 0x134   : > { %v451_v10 = vpop.xlane.xlu1 %450  ;;  %v495_v21 = vmul.f32 %v2243_v63, %v2243_v63 }
 0x135   : > { %v449_v4 = vpop.xlane.xlu0 %448  ;;  %v475_v51 = vmul.f32 0.0078125, %v451_v10  ;;  %1420 = vmatmul.mubr.bf16.gmra.mrb[4].mxu0 %v669_v12 }
 0x136   : > { %v474_v7 = vmul.f32 0.0078125, %v449_v4 }
 0x137   : > { %v1579_v13 = vpop.eup %1578  ;;  %v513_v14 = vsub.f32 %v475_v51, %v494_v5 }
 0x138   : > { %v512_v15 = vsub.f32 %v474_v7, %v493_v3  ;;  %v1581_v16 = vpop.eup %1580  ;;  %v455_v24 = vpop.xlane.xlu1 %454  ;;  %v611_v30 = vmul.f32 %v1579_v13, %v2179_v47 }
 0x139   : > { %v453_v8 = vpop.xlane.xlu0 %452  ;;  %v532_v25 = vmax.f32 %v513_v14, 0.0  ;;  %v477_v27 = vmul.f32 0.0078125, %v455_v24  ;;  %v610_v19 = vmul.f32 %v1581_v16, %v2179_v47 }
 0x13a   : > { %v531_v26 = vmax.f32 %v512_v15, 0.0  ;;  %v476_v28 = vmul.f32 0.0078125, %v453_v8  ;;  %v630_v49 = vmul.f32 %v611_v30, %v585_v17 }
 0x13b   : > { %v1583_v50 = vpop.eup %1582  ;;  %v551_v29 = vadd.f32 1e-05, %v532_v25  ;;  %v515_v39 = vsub.f32 %v477_v27, %v496_v18  ;;  %v629_v33 = vmul.f32 %v610_v19, %v584_v1  ;;  %v588_v27 = vsub.f32 %v2110_v32, %v2238_v61 }
 0x13c   : > { %v550_v38 = vadd.f32 1e-05, %v531_v26  ;;  %v514_v42 = vsub.f32 %v476_v28, %v495_v21  ;;  %v1585_v44 = vpop.eup %1584  ;;  %v383_v46 = vpop.xlane.xlu1 %382  ;;  %v656_v48 = vadd.f32 %v2191_v6, %v630_v49  ;;  %v613_v54 = vmul.f32 %v1583_v50, %v2179_v47 }
 0x13d   : > { %v381_v9 = vpop.xlane.xlu0 %380  ;;  %1586 = vrsqrt.f32 %v551_v29  ;;  %v534_v0 = vmax.f32 %v515_v39, 0.0  ;;  %v655_v2 = vadd.f32 %v2191_v6, %v629_v33  ;;  %v612_v53 = vmul.f32 %v1585_v44, %v2179_v47 }
 0x13e   : > { %v533_v20 = vmax.f32 %v514_v42, 0.0  ;;  %1588 = vrsqrt.f32 %v550_v38  ;;  %v2264_v52 = vmul.f32 0.0078125, %v381_v9  ;;  %v2270_v58 = vmul.f32 0.0078125, %v383_v46 }
 0x13f   : > { %v553_v56 = vadd.f32 1e-05, %v534_v0  ;;  %v670_v37 = vpack.c.bf16 %v656_v48, %v655_v2  ;;  %v631_v36 = vmul.f32 %v612_v53, %v586_v45  ;;  %v632_v3 = vmul.f32 %v613_v54, %v587_v23 }
 0x140   : > { %v552_v57 = vadd.f32 1e-05, %v533_v20  ;;  %v497_v59 = vmul.f32 %v2264_v52, %v2264_v52  ;;  %v457_v11 = vpop.xlane.xlu1 %456  ;;  %v498_v7 = vmul.f32 %v2270_v58, %v2270_v58  ;;  %v589_v26 = vsub.f32 %v2107_v31, %v2236_v60 }
 0x141   : > { %v385_v10 = vpop.xlane.xlu0 %384  ;;  %1590 = vrsqrt.f32 %v553_v56  ;;  %v478_v4 = vmul.f32 0.0078125, %v457_v11  ;;  %1423 = vmatprep.mubr.bf16.mxu0 %v670_v37  ;;  %v657_v51 = vadd.f32 %v2191_v6, %v631_v36  ;;  %v658_v55 = vadd.f32 %v2191_v6, %v632_v3  ;;  %v1560_v3 = vld [vmem:[#allocation7 + $0x30] sm:$0xff]  }
 0x142   : > { %v404_v5 = vmul.f32 0.0078125, %v385_v10  ;;  %1592 = vrsqrt.f32 %v552_v57  ;;  %v591_v45 = vsub.f32 %v2115_v34, %v2241_v62  ;;  %v590_v60 = vsub.f32 %v2118_v35, %v2243_v63 }
 0x143   : > { %v516_v22 = vsub.f32 %v478_v4, %v497_v59  ;;  %v671_v17 = vpack.c.bf16 %v658_v55, %v657_v51  ;;  %v592_v63 = vsub.f32 %v2134_v41, %v2264_v52  ;;  %v593_v56 = vsub.f32 %v2131_v40, %v2270_v58  ;;  %v1556_v40 = vld [vmem:[#allocation7 + $0x10] sm:$0xff]   ;;  %v1558_v58 = vld [vmem:[#allocation7 + $0x20] sm:$0xff]   ;;  %v1561_v51 = vld [vmem:[#allocation7 + $0x38] sm:$0xff]  }
 0x144   : > { %v499_v12 = vmul.f32 %v404_v5, %v404_v5  ;;  %v461_v13 = vpop.xlane.xlu1 %460  ;;  %v594_v53 = vsub.f32 %v2141_v43, %v404_v5  ;;  %v1554_v43 = vld [vmem:[#allocation7] sm:$0xff]   ;;  %v1555_v5 = vld [vmem:[#allocation7 + $0x8] sm:$0xff]  }
 0x145   : > { %v459_v14 = vpop.xlane.xlu0 %458  ;;  %v535_v15 = vmax.f32 %v516_v22, 0.0  ;;  %v480_v16 = vmul.f32 0.0078125, %v461_v13  ;;  %1424 = vmatmul.mubr.bf16.gmra.mrb[8].mxu0 %v671_v17  ;;  %1435 = vmatprep.subr.bf16.mxu1 %v1554_v43  ;;  %v2308_v22 = vld [vmem:[%s2482_s4] ss:$0 sm:$0xff] }
 0x146   : > { %v479_v18 = vmul.f32 0.0078125, %v459_v14  ;;  %1436 = vmatpush3.bf16.msra.mxu1 %v1554_v43 }
 0x147   : > { %v1587_v21 = vpop.eup %1586  ;;  %v554_v24 = vadd.f32 1e-05, %v535_v15  ;;  %v518_v8 = vsub.f32 %v480_v16, %v499_v12  ;;  %1437 = vmatprep.subr.bf16.mxu1 %v1555_v5 }
 0x148   : > { %v517_v30 = vsub.f32 %v479_v18, %v498_v7  ;;  %v1589_v25 = vpop.eup %1588  ;;  %v615_v28 = vmul.f32 %v1587_v21, %v2179_v47 }
 0x149   : > { %1594 = vrsqrt.f32 %v554_v24  ;;  %v537_v1 = vmax.f32 %v518_v8, 0.0  ;;  %v614_v49 = vmul.f32 %v1589_v25, %v2179_v47 }
 0x14a   : > { %v536_v19 = vmax.f32 %v517_v30, 0.0  ;;  %v634_v50 = vmul.f32 %v615_v28, %v589_v26  ;;  %1438 = vmatpush3.bf16.msra.mxu1 %v1555_v5 }
 0x14b   : > { %v1591_v29 = vpop.eup %1590  ;;  %v556_v38 = vadd.f32 1e-05, %v537_v1  ;;  %v633_v42 = vmul.f32 %v614_v49, %v588_v27  ;;  %1439 = vmatprep.subr.bf16.mxu1 %v1556_v40 }
 0x14c   : > { %v555_v39 = vadd.f32 1e-05, %v536_v19  ;;  %v1593_v44 = vpop.eup %1592  ;;  %v660_v31 = vadd.f32 %v2191_v6, %v634_v50  ;;  %v617_v32 = vmul.f32 %v1591_v29, %v2179_v47 }
 0x14d   : > { %1596 = vrsqrt.f32 %v556_v38  ;;  %v659_v61 = vadd.f32 %v2191_v6, %v633_v42  ;;  %v616_v46 = vmul.f32 %v1593_v44, %v2179_v47 }
 0x14e   : > { %1598 = vrsqrt.f32 %v555_v39  ;;  %v636_v9 = vmul.f32 %v617_v32, %v591_v45  ;;  %1440 = vmatpush3.bf16.msra.mxu1 %v1556_v40 }
 0x14f   : > { %v672_v33 = vpack.c.bf16 %v660_v31, %v659_v61  ;;  %v635_v48 = vmul.f32 %v616_v46, %v590_v60 }
 0x150   : > { %v662_v0 = vadd.f32 %v2191_v6, %v636_v9 }
 0x151   : > { %1427 = vmatprep.mubr.bf16.mxu0 %v672_v33  ;;  %v661_v34 = vadd.f32 %v2191_v6, %v635_v48 }
 0x153   : > { %v1595_v62 = vpop.eup %1594  ;;  %v673_v20 = vpack.c.bf16 %v662_v0, %v661_v34 }
 0x154   : > { %v618_v54 = vmul.f32 %v1595_v62, %v2179_v47 }
 0x155   : > { %1428 = vmatmul.mubr.bf16.gmra.mrb[12].mxu0 %v673_v20 }
 0x156   : > { %v637_v59 = vmul.f32 %v618_v54, %v592_v63 }
 0x157   : > { %v1597_v35 = vpop.eup %1596 }
 0x158   : > { %v1599_v2 = vpop.eup %1598  ;;  %v620_v23 = vmul.f32 %v1597_v35, %v2179_v47  ;;  %v663_v36 = vadd.f32 %v2191_v6, %v637_v59 }
 0x159   : > { %v619_v57 = vmul.f32 %v1599_v2, %v2179_v47  ;;  %v1557_v47 = vld [vmem:[#allocation7 + $0x18] sm:$0xff]  }
 0x15a   : > { %v639_v11 = vmul.f32 %v620_v23, %v594_v53  ;;  %1441 = vmatprep.subr.bf16.mxu1 %v1557_v47 }
 0x15b   : > { %v638_v37 = vmul.f32 %v619_v57, %v593_v56  ;;  %1442 = vmatpush3.bf16.msra.mxu1 %v1557_v47 }
 0x15c   : > { %v665_v10 = vadd.f32 %v2191_v6, %v639_v11  ;;  %1443 = vmatprep.subr.bf16.mxu1 %v1558_v58 }
 0x15d   : > { %v664_v4 = vadd.f32 %v2191_v6, %v638_v37  ;;  %v1559_v6 = vld [vmem:[#allocation7 + $0x28] sm:$0xff]  }
 0x15e   : > { %v675_v41 = vpack.c.bf16 %v665_v10, %v665_v10 }
 0x15f   : > { %v674_v52 = vpack.c.bf16 %v664_v4, %v663_v36  ;;  %1444 = vmatpush3.bf16.msra.mxu1 %v1558_v58 }
 0x160   : > { %1445 = vmatprep.subr.bf16.mxu1 %v1559_v6 }
 0x161   : > { %1431 = vmatprep.mubr.bf16.mxu0 %v674_v52 }
 0x162   : > { %1432 = vmatmul.mubr.bf16.gmra.mrb[16].mxu0 %v675_v41 }
 0x163   : > { %1446 = vmatpush3.bf16.msra.mxu1 %v1559_v6 }
 0x164   : > { %1447 = vmatprep.subr.bf16.mxu1 %v1560_v3 }
 0x167   : > { %1448 = vmatpush3.bf16.msra.mxu1 %v1560_v3 }
 0x168   : > { %1449 = vmatprep.subr.bf16.mxu1 %v1561_v51 }
 0x16b   : > { %1450 = vmatpush3.bf16.msra.mxu1 %v1561_v51 }
 0x1f8   : > { %v1417_v55 = vpop.f32.mrb[0].mxu0 }
 0x1f9   : > { %v790_v7 = vadd.f32 %v1417_v55, %v2308_v22  ;;  %v781_v12 = vpop.f32.mrb[1].mxu0 }
 0x1fa   : > { %v782_v13 = vadd.f32 %v2308_v22, %v781_v12  ;;  %v1418_v14 = vpop.f32.mrb[2].mxu0 }
 0x1fb   : > { %v861_v15 = vmul.f32 0.035677407, %v790_v7  ;;  %v793_v16 = vadd.f32 %v1418_v14, %v2308_v22  ;;  %v784_v17 = vpop.f32.mrb[3].mxu0  ;;  %v937_v35 = vmul.f32 0.5, %v790_v7 }
 0x1fc   : > { %v859_v18 = vmul.f32 0.035677407, %v782_v13  ;;  %v785_v21 = vadd.f32 %v2308_v22, %v784_v17  ;;  %v935_v56 = vmul.f32 0.5, %v782_v13 }
 0x1fd   : > { %v880_v24 = vmul.f32 %v861_v15, %v790_v7  ;;  %v862_v8 = vmul.f32 0.035677407, %v793_v16  ;;  %v938_v10 = vmul.f32 0.5, %v793_v16 }
 0x1fe   : > { %v878_v30 = vmul.f32 %v859_v18, %v782_v13  ;;  %v860_v25 = vmul.f32 0.035677407, %v785_v21  ;;  %v936_v52 = vmul.f32 0.5, %v785_v21 }
 0x1ff   : > { %v899_v26 = vadd.f32 0.7978846, %v880_v24  ;;  %v881_v27 = vmul.f32 %v862_v8, %v793_v16 }
 0x200   : > { %v897_v28 = vadd.f32 0.7978846, %v878_v30  ;;  %v879_v1 = vmul.f32 %v860_v25, %v785_v21 }
 0x201   : > { %v918_v19 = vmul.f32 %v899_v26, %v790_v7  ;;  %v900_v49 = vadd.f32 0.7978846, %v881_v27 }
 0x202   : > { %v898_v50 = vadd.f32 0.7978846, %v879_v1  ;;  %v916_v29 = vmul.f32 %v897_v28, %v782_v13 }
 0x203   : > { %1600 = vtanh.f32 %v918_v19  ;;  %v919_v38 = vmul.f32 %v900_v49, %v793_v16 }
 0x204   : > { %v917_v39 = vmul.f32 %v898_v50, %v785_v21  ;;  %1602 = vtanh.f32 %v916_v29 }
 0x205   : > { %1604 = vtanh.f32 %v919_v38 }
 0x206   : > { %1606 = vtanh.f32 %v917_v39 }
 0x208   : > { %v1421_v42 = vpop.f32.mrb[4].mxu0 }
 0x209   : > { %v2315_v44 = vadd.f32 %v1421_v42, %v2308_v22  ;;  %v797_v45 = vpop.f32.mrb[5].mxu0 }
 0x20a   : > { %v2318_v31 = vadd.f32 %v2308_v22, %v797_v45  ;;  %v1422_v32 = vpop.f32.mrb[6].mxu0 }
 0x20b   : > { %v865_v60 = vmul.f32 0.035677407, %v2315_v44  ;;  %v2322_v61 = vadd.f32 %v1422_v32, %v2308_v22  ;;  %v800_v46 = vpop.f32.mrb[7].mxu0  ;;  %v941_v29 = vmul.f32 0.5, %v2315_v44 }
 0x20c   : > { %v863_v9 = vmul.f32 0.035677407, %v2318_v31  ;;  %v2326_v33 = vadd.f32 %v2308_v22, %v800_v46  ;;  %v939_v32 = vmul.f32 0.5, %v2318_v31 }
 0x20d   : > { %v1601_v48 = vpop.eup %1600  ;;  %v884_v0 = vmul.f32 %v865_v60, %v2315_v44  ;;  %v866_v34 = vmul.f32 0.035677407, %v2322_v61 }
 0x20e   : > { %v1603_v62 = vpop.eup %1602  ;;  %v882_v20 = vmul.f32 %v863_v9, %v2318_v31  ;;  %v864_v54 = vmul.f32 0.035677407, %v2326_v33  ;;  %v975_v63 = vadd.f32 1.0, %v1601_v48 }
 0x20f   : > { %v1605_v2 = vpop.eup %1604  ;;  %v903_v53 = vadd.f32 0.7978846, %v884_v0  ;;  %v885_v23 = vmul.f32 %v866_v34, %v2322_v61  ;;  %v973_v57 = vadd.f32 1.0, %v1603_v62  ;;  %v942_v0 = vmul.f32 0.5, %v2322_v61 }
 0x210   : > { %v1607_v59 = vpop.eup %1606  ;;  %v901_v11 = vadd.f32 0.7978846, %v882_v20  ;;  %v883_v37 = vmul.f32 %v864_v54, %v2326_v33  ;;  %v976_v36 = vadd.f32 1.0, %v1605_v2  ;;  %v994_v47 = vmul.f32 %v975_v63, %v937_v35 }
 0x211   : > { %v922_v4 = vmul.f32 %v903_v53, %v2315_v44  ;;  %v904_v41 = vadd.f32 0.7978846, %v885_v23  ;;  %v974_v43 = vadd.f32 1.0, %v1607_v59  ;;  %v992_v3 = vmul.f32 %v973_v57, %v935_v56 }
 0x212   : > { %v920_v5 = vmul.f32 %v901_v11, %v2318_v31  ;;  %v902_v40 = vadd.f32 0.7978846, %v883_v37  ;;  %v995_v58 = vmul.f32 %v976_v36, %v938_v10  ;;  %v940_v44 = vmul.f32 0.5, %v2326_v33 }
 0x213   : > { %1608 = vtanh.f32 %v922_v4  ;;  %v923_v6 = vmul.f32 %v904_v41, %v2322_v61  ;;  %v993_v51 = vmul.f32 %v974_v43, %v936_v52 }
 0x214   : > { %1610 = vtanh.f32 %v920_v5  ;;  %v921_v55 = vmul.f32 %v902_v40, %v2326_v33  ;;  %v1012_v7 = vpack.c.bf16 %v995_v58, %v994_v47 }
 0x215   : > { %1612 = vtanh.f32 %v923_v6  ;;  %v1011_v12 = vpack.c.bf16 %v993_v51, %v992_v3 }
 0x216   : > { %1614 = vtanh.f32 %v921_v55 }
 0x217   : > { %1451 = vmatprep.mubr.bf16.mxu1 %v1011_v12 }
 0x218   : > { %v1425_v13 = vpop.f32.mrb[8].mxu0  ;;  %1452 = vmatmul.mubr.bf16.vlgmr.msra.gmra.mrb[0].mxu1 %v1012_v7 }
 0x219   : > { %v2339_v14 = vadd.f32 %v1425_v13, %v2308_v22  ;;  %v813_v15 = vpop.f32.mrb[9].mxu0 }
 0x21a   : > { %v2342_v16 = vadd.f32 %v2308_v22, %v813_v15  ;;  %v1426_v17 = vpop.f32.mrb[10].mxu0 }
 0x21b   : > { %v869_v18 = vmul.f32 0.035677407, %v2339_v14  ;;  %v2346_v21 = vadd.f32 %v1426_v17, %v2308_v22  ;;  %v816_v24 = vpop.f32.mrb[11].mxu0  ;;  %v945_v12 = vmul.f32 0.5, %v2339_v14 }
 0x21c   : > { %v867_v8 = vmul.f32 0.035677407, %v2342_v16  ;;  %v2350_v30 = vadd.f32 %v2308_v22, %v816_v24  ;;  %v943_v24 = vmul.f32 0.5, %v2342_v16 }
 0x21d   : > { %v888_v25 = vmul.f32 %v869_v18, %v2339_v14  ;;  %v870_v26 = vmul.f32 0.035677407, %v2346_v21  ;;  %v1609_v27 = vpop.eup %1608 }
 0x21e   : > { %v886_v28 = vmul.f32 %v867_v8, %v2342_v16  ;;  %v868_v1 = vmul.f32 0.035677407, %v2350_v30  ;;  %v1611_v19 = vpop.eup %1610  ;;  %v979_v38 = vadd.f32 1.0, %v1609_v27 }
 0x21f   : > { %v907_v49 = vadd.f32 0.7978846, %v888_v25  ;;  %v889_v50 = vmul.f32 %v870_v26, %v2346_v21  ;;  %v1613_v39 = vpop.eup %1612  ;;  %v977_v60 = vadd.f32 1.0, %v1611_v19 }
 0x220   : > { %v905_v42 = vadd.f32 0.7978846, %v886_v28  ;;  %v887_v45 = vmul.f32 %v868_v1, %v2350_v30  ;;  %v1615_v46 = vpop.eup %1614  ;;  %v980_v34 = vadd.f32 1.0, %v1613_v39  ;;  %v998_v63 = vmul.f32 %v979_v38, %v941_v29 }
 0x221   : > { %v926_v9 = vmul.f32 %v907_v49, %v2339_v14  ;;  %v908_v48 = vadd.f32 0.7978846, %v889_v50  ;;  %v978_v54 = vadd.f32 1.0, %v1615_v46  ;;  %v996_v53 = vmul.f32 %v977_v60, %v939_v32 }
 0x222   : > { %v924_v62 = vmul.f32 %v905_v42, %v2342_v16  ;;  %v906_v20 = vadd.f32 0.7978846, %v887_v45  ;;  %v999_v2 = vmul.f32 %v980_v34, %v942_v0  ;;  %v946_v28 = vmul.f32 0.5, %v2346_v21 }
 0x223   : > { %1616 = vtanh.f32 %v926_v9  ;;  %v927_v35 = vmul.f32 %v908_v48, %v2346_v21  ;;  %v997_v23 = vmul.f32 %v978_v54, %v940_v44  ;;  %v944_v14 = vmul.f32 0.5, %v2350_v30 }
 0x224   : > { %1618 = vtanh.f32 %v924_v62  ;;  %v925_v31 = vmul.f32 %v906_v20, %v2350_v30  ;;  %v1014_v56 = vpack.c.bf16 %v999_v2, %v998_v63 }
 0x225   : > { %1620 = vtanh.f32 %v927_v35  ;;  %v1013_v61 = vpack.c.bf16 %v997_v23, %v996_v53 }
 0x226   : > { %1622 = vtanh.f32 %v925_v31 }
 0x227   : > { %1455 = vmatprep.mubr.bf16.mxu1 %v1013_v61 }
 0x228   : > { %v1429_v57 = vpop.f32.mrb[12].mxu0  ;;  %1456 = vmatmul.mubr.bf16.gmra.mrb[4].mxu1 %v1014_v56 }
 0x229   : > { %v2367_v59 = vadd.f32 %v1429_v57, %v2308_v22  ;;  %v829_v33 = vpop.f32.mrb[13].mxu0 }
 0x22a   : > { %v2370_v11 = vadd.f32 %v2308_v22, %v829_v33  ;;  %v1430_v37 = vpop.f32.mrb[14].mxu0 }
 0x22b   : > { %v873_v10 = vmul.f32 0.035677407, %v2367_v59  ;;  %v2374_v36 = vadd.f32 %v1430_v37, %v2308_v22  ;;  %v832_v4 = vpop.f32.mrb[15].mxu0  ;;  %v949_v37 = vmul.f32 0.5, %v2367_v59 }
 0x22c   : > { %v871_v41 = vmul.f32 0.035677407, %v2370_v11  ;;  %v2378_v52 = vadd.f32 %v2308_v22, %v832_v4 }
 0x22d   : > { %v892_v43 = vmul.f32 %v873_v10, %v2367_v59  ;;  %v874_v5 = vmul.f32 0.035677407, %v2374_v36  ;;  %v1617_v58 = vpop.eup %1616  ;;  %v950_v4 = vmul.f32 0.5, %v2374_v36 }
 0x22e   : > { %v890_v40 = vmul.f32 %v871_v41, %v2370_v11  ;;  %v872_v47 = vmul.f32 0.035677407, %v2378_v52  ;;  %v1619_v51 = vpop.eup %1618  ;;  %v983_v13 = vadd.f32 1.0, %v1617_v58 }
 0x22f   : > { %v911_v6 = vadd.f32 0.7978846, %v892_v43  ;;  %v893_v3 = vmul.f32 %v874_v5, %v2374_v36  ;;  %v1621_v15 = vpop.eup %1620  ;;  %v981_v8 = vadd.f32 1.0, %v1619_v51  ;;  %v948_v5 = vmul.f32 0.5, %v2378_v52 }
 0x230   : > { %v909_v55 = vadd.f32 0.7978846, %v890_v40  ;;  %v891_v7 = vmul.f32 %v872_v47, %v2378_v52  ;;  %v1623_v25 = vpop.eup %1622  ;;  %v984_v1 = vadd.f32 1.0, %v1621_v15  ;;  %v1002_v29 = vmul.f32 %v983_v13, %v945_v12 }
 0x231   : > { %v930_v17 = vmul.f32 %v911_v6, %v2367_v59  ;;  %v912_v18 = vadd.f32 0.7978846, %v893_v3  ;;  %v982_v49 = vadd.f32 1.0, %v1623_v25  ;;  %v1000_v39 = vmul.f32 %v981_v8, %v943_v24 }
 0x232   : > { %v928_v26 = vmul.f32 %v909_v55, %v2370_v11  ;;  %v910_v27 = vadd.f32 0.7978846, %v891_v7  ;;  %v1003_v38 = vmul.f32 %v984_v1, %v946_v28 }
 0x233   : > { %1624 = vtanh.f32 %v930_v17  ;;  %v931_v19 = vmul.f32 %v912_v18, %v2374_v36  ;;  %v1001_v42 = vmul.f32 %v982_v49, %v944_v14 }
 0x234   : > { %1626 = vtanh.f32 %v928_v26  ;;  %v929_v50 = vmul.f32 %v910_v27, %v2378_v52  ;;  %v1016_v32 = vpack.c.bf16 %v1003_v38, %v1002_v29  ;;  %v1349_v27 = vld [vmem:[%s2484_s6] ss:$0 sm:$0xff] }
 0x235   : > { %1628 = vtanh.f32 %v931_v19  ;;  %v1433_v16 = vpop.f32.mrb[16].mxu0  ;;  %v1015_v9 = vpack.c.bf16 %v1001_v42, %v1000_v39 }
 0x236   : > { %1630 = vtanh.f32 %v929_v50  ;;  %v854_v45 = vadd.f32 %v1433_v16, %v2308_v22  ;;  %v845_v21 = vpop.f32.mrb[17].mxu0 }
 0x237   : > { %v846_v60 = vadd.f32 %v2308_v22, %v845_v21  ;;  %v1434_v46 = vpop.f32.mrb[18].mxu0  ;;  %1459 = vmatprep.mubr.bf16.mxu1 %v1015_v9 }
 0x238   : > { %v877_v30 = vmul.f32 0.035677407, %v854_v45  ;;  %v848_v48 = vpop.f32.mrb[19].mxu0  ;;  %1460 = vmatmul.mubr.bf16.gmra.mrb[8].mxu1 %v1016_v32  ;;  %v953_v13 = vmul.f32 0.5, %v854_v45 }
 0x239   : > { %v875_v0 = vmul.f32 0.035677407, %v846_v60  ;;  %v849_v34 = vadd.f32 %v2308_v22, %v848_v48  ;;  %v947_v22 = vmul.f32 0.5, %v2370_v11  ;;  %v951_v15 = vmul.f32 0.5, %v846_v60 }
 0x23a   : > { %v896_v62 = vmul.f32 %v877_v30, %v854_v45 }
 0x23b   : > { %v894_v20 = vmul.f32 %v875_v0, %v846_v60  ;;  %v876_v44 = vmul.f32 0.035677407, %v849_v34  ;;  %v952_v17 = vmul.f32 0.5, %v849_v34 }
 0x23c   : > { %v915_v54 = vadd.f32 0.7978846, %v896_v62 }
 0x23d   : > { %v1625_v35 = vpop.eup %1624  ;;  %v913_v63 = vadd.f32 0.7978846, %v894_v20  ;;  %v895_v2 = vmul.f32 %v876_v44, %v849_v34 }
 0x23e   : > { %v1627_v31 = vpop.eup %1626  ;;  %v934_v53 = vmul.f32 %v915_v54, %v854_v45  ;;  %v987_v23 = vadd.f32 1.0, %v1625_v35 }
 0x23f   : > { %v1629_v56 = vpop.eup %1628  ;;  %v932_v61 = vmul.f32 %v913_v63, %v846_v60  ;;  %v914_v57 = vadd.f32 0.7978846, %v895_v2  ;;  %v985_v33 = vadd.f32 1.0, %v1627_v31 }
 0x240   : > { %v1631_v10 = vpop.eup %1630  ;;  %1632 = vtanh.f32 %v934_v53  ;;  %v988_v41 = vadd.f32 1.0, %v1629_v56  ;;  %v1006_v47 = vmul.f32 %v987_v23, %v949_v37 }
 0x241   : > { %1634 = vtanh.f32 %v932_v61  ;;  %v933_v43 = vmul.f32 %v914_v57, %v849_v34  ;;  %v986_v40 = vadd.f32 1.0, %v1631_v10  ;;  %v1004_v6 = vmul.f32 %v985_v33, %v947_v22 }
 0x242   : > { %v1007_v58 = vmul.f32 %v988_v41, %v950_v4 }
 0x243   : > { %1636 = vtanh.f32 %v933_v43  ;;  %v1005_v3 = vmul.f32 %v986_v40, %v948_v5 }
 0x244   : > { %v1018_v51 = vpack.c.bf16 %v1007_v58, %v1006_v47 }
 0x245   : > { %v1017_v55 = vpack.c.bf16 %v1005_v3, %v1004_v6 }
 0x247   : > { %1463 = vmatprep.mubr.bf16.mxu1 %v1017_v55 }
 0x248   : > { %1464 = vmatmul.mubr.bf16.gmra.mrb[12].mxu1 %v1018_v51 }
 0x24a   : > { %v1633_v59 = vpop.eup %1632 }
 0x24b   : > { %v1635_v7 = vpop.eup %1634  ;;  %v991_v11 = vadd.f32 1.0, %v1633_v59 }
 0x24c   : > { %v989_v12 = vadd.f32 1.0, %v1635_v7 }
 0x24d   : > { %v1637_v36 = vpop.eup %1636  ;;  %v1010_v18 = vmul.f32 %v991_v11, %v953_v13 }
 0x24e   : > { %v990_v52 = vadd.f32 1.0, %v1637_v36  ;;  %v1008_v24 = vmul.f32 %v989_v12, %v951_v15 }
 0x24f   : > { %v1020_v26 = vpack.c.bf16 %v1010_v18, %v1010_v18 }
 0x250   : > { %v1009_v8 = vmul.f32 %v990_v52, %v952_v17 }
 0x252   : > { %v1019_v25 = vpack.c.bf16 %v1009_v8, %v1008_v24 }
 0x254   : > { %1467 = vmatprep.mubr.bf16.mxu1 %v1019_v25 }
 0x255   : > { %1468 = vmatmul.mubr.bf16.gmra.mrb[16].mxu1 %v1020_v26 }
 0x2eb   : > { %v1453_v28 = vpop.f32.mrb[0].mxu1 }
 0x2ec   : > { %v1135_v1 = vadd.f32 %v1453_v28, %v1349_v27  ;;  %v1126_v19 = vpop.f32.mrb[1].mxu1 }
 0x2ed   : > { %v1127_v14 = vadd.f32 %v1349_v27, %v1126_v19  ;;  %v1454_v49 = vpop.f32.mrb[2].mxu1 }
 0x2ee   : > { %1206 = vst [vmem:[%s2406_s3 + $0x10] sm:$0xff] %v1135_v1  ;;  %v1138_v50 = vadd.f32 %v1454_v49, %v1349_v27  ;;  %v1129_v29 = vpop.f32.mrb[3].mxu1 }
 0x2ef   : > { %1204 = vst [vmem:[%s2406_s3] sm:$0xff] %v1127_v14  ;;  %v1130_v38 = vadd.f32 %v1349_v27, %v1129_v29 }
 0x2f0   : > { %1207 = vst [vmem:[%s2406_s3 + $0x18] sm:$0xff] %v1138_v50 }
 0x2f1   : > { %1205 = vst [vmem:[%s2406_s3 + $0x8] sm:$0xff] %v1130_v38 }
 0x2fb   : > { %v1457_v16 = vpop.f32.mrb[4].mxu1 }
 0x2fc   : > { %v1151_v39 = vadd.f32 %v1457_v16, %v1349_v27  ;;  %v1142_v42 = vpop.f32.mrb[5].mxu1 }
 0x2fd   : > { %v1143_v45 = vadd.f32 %v1349_v27, %v1142_v42  ;;  %v1458_v21 = vpop.f32.mrb[6].mxu1 }
 0x2fe   : > { %1210 = vst [vmem:[%s2406_s3 + $0x30] sm:$0xff] %v1151_v39  ;;  %v1154_v32 = vadd.f32 %v1458_v21, %v1349_v27  ;;  %v1145_v60 = vpop.f32.mrb[7].mxu1 }
 0x2ff   : > { %1208 = vst [vmem:[%s2406_s3 + $0x20] sm:$0xff] %v1143_v45  ;;  %v1146_v46 = vadd.f32 %v1349_v27, %v1145_v60 }
 0x300   : > { %1211 = vst [vmem:[%s2406_s3 + $0x38] sm:$0xff] %v1154_v32 }
 0x301   : > { %1209 = vst [vmem:[%s2406_s3 + $0x28] sm:$0xff] %v1146_v46 }
 0x30b   : > { %v1461_v9 = vpop.f32.mrb[8].mxu1 }
 0x30c   : > { %v1167_v30 = vadd.f32 %v1461_v9, %v1349_v27  ;;  %v1158_v48 = vpop.f32.mrb[9].mxu1 }
 0x30d   : > { %v1159_v0 = vadd.f32 %v1349_v27, %v1158_v48  ;;  %v1462_v34 = vpop.f32.mrb[10].mxu1 }
 0x30e   : > { %1214 = vst [vmem:[%s2406_s3 + $0x50] sm:$0xff] %v1167_v30  ;;  %v1170_v62 = vadd.f32 %v1462_v34, %v1349_v27  ;;  %v1161_v20 = vpop.f32.mrb[11].mxu1 }
 0x30f   : > { %1212 = vst [vmem:[%s2406_s3 + $0x40] sm:$0xff] %v1159_v0  ;;  %v1162_v44 = vadd.f32 %v1349_v27, %v1161_v20 }
 0x310   : > { %1215 = vst [vmem:[%s2406_s3 + $0x58] sm:$0xff] %v1170_v62 }
 0x311   : > { %1213 = vst [vmem:[%s2406_s3 + $0x48] sm:$0xff] %v1162_v44 }
 0x31b   : > { %v1465_v54 = vpop.f32.mrb[12].mxu1 }
 0x31c   : > { %v1183_v35 = vadd.f32 %v1465_v54, %v1349_v27  ;;  %v1174_v63 = vpop.f32.mrb[13].mxu1 }
 0x31d   : > { %v1175_v2 = vadd.f32 %v1349_v27, %v1174_v63  ;;  %v1466_v31 = vpop.f32.mrb[14].mxu1 }
 0x31e   : > { %1218 = vst [vmem:[%s2406_s3 + $0x70] sm:$0xff] %v1183_v35  ;;  %v1186_v53 = vadd.f32 %v1466_v31, %v1349_v27  ;;  %v1177_v23 = vpop.f32.mrb[15].mxu1 }
 0x31f   : > { %1216 = vst [vmem:[%s2406_s3 + $0x60] sm:$0xff] %v1175_v2  ;;  %v1178_v56 = vadd.f32 %v1349_v27, %v1177_v23 }
 0x320   : > { %1219 = vst [vmem:[%s2406_s3 + $0x78] sm:$0xff] %v1186_v53 }
 0x321   : > { %1217 = vst [vmem:[%s2406_s3 + $0x68] sm:$0xff] %v1178_v56 }
 0x328   : > { %v1469_v61 = vpop.f32.mrb[16].mxu1 }
 0x329   : > { %v1199_v57 = vadd.f32 %v1469_v61, %v1349_v27  ;;  %v1190_v33 = vpop.f32.mrb[17].mxu1 }
 0x32a   : > { %v1191_v37 = vadd.f32 %v1349_v27, %v1190_v33  ;;  %v1470_v10 = vpop.f32.mrb[18].mxu1 }
 0x32b   : > { %1222 = vst [vmem:[%s2406_s3 + $0x90] sm:$0xff] %v1199_v57  ;;  %v1193_v22 = vpop.f32.mrb[19].mxu1 }
 0x32c   : > { %1220 = vst [vmem:[%s2406_s3 + $0x80] sm:$0xff] %v1191_v37  ;;  %v1194_v4 = vadd.f32 %v1349_v27, %v1193_v22 }
 0x32e   : > { %1221 = vst [vmem:[%s2406_s3 + $0x88] sm:$0xff] %v1194_v4 }
 0x32f   : > { %1737 = shalt.err (!%p1734_p2)
}
 0x330   : > { %s1738_s22 = scalar_lea.hbm %s2430_s18, 2432  ;;  %s1742_s11 = scalar_lea.hbm %s2485_s7, 4864 }
 0x331   : > { %p1739_p13 = scmp.ne.s32.totalorder %s2430_s18, %s1738_s22  ;;  %p1743_p4 = scmp.lt.u32.totalorder %s2430_s18, %s2485_s7 }
 0x332   : > { %p1744_p5 = scmp.lt.u32.totalorder %s1742_s11, %s1738_s22  ;;  %p1746_p11 = scmp.lt.u32.totalorder %s1738_s22, %s2430_s18 }
 0x333   : > { %p1740_p6 = pnand %p1739_p13, %p2501_p0 }
 0x334   : > { %p1745_p8 = por %p1744_p5, %p1743_p4 }
 0x335   : > { %p1741_p10 = pneg %p1740_p6 }
 0x336   : > { %p1747_p1 = por %p1746_p11, %p1745_p8 }
 0x338   : > { %p1748_p3 = pnand %p1747_p1, %p1741_p10 }
 0x33a   : > { %1751 = shalt.err (!%p1748_p3)
}
 0x33b   : > { %s1804_s29 = smov 128   ;;  %s1805_s20 = smov 8  }
 0x33c   : > { %1483 = dma.vmem_to_hbm [thread:$0]  (%p2501_p0), %s2433_s15, 2432, %s2430_s18, %s1224_s28, %s1804_s29, %s1804_s29, %s1805_s20  }
 0x33d PF: > { %s1252_s30 = sand.u32 1, %s1782_s24   ;;  %p2502_p7 = scmp.ne.s32.totalorder %s2491_s8, 0 }
 0x33e   : > { %p2503_p9 = scmp.ge.s32.totalorder %s1794_s27, 2  ;;  %s1253_s9 = scalar_lea.sflag [#allocation4], %s1252_s30 }
 0x340   : > { %p1497_p12 = pnand %p2503_p9, %p2502_p7 }
 0x342   : > { %1777 = dma.done.wait (!%p1497_p12), %s1253_s9, 2432  }
 0x343   : > { %1779 = vsyncadd (!%p1497_p12), %s1253_s9, 4294964864  ;;  %p21_p2 = scmp.ge.s32.totalorder %s1956_s13, 4   ;;  %s2504_s24 = smov %s1786_s25 }
 0x344   : > { %s2505_s25 = smov %s1790_s26  ;;  %s2506_s26 = smov %s1972_s17 }
 0x345   : > { %s2507_s27 = smov %s1956_s13  ;;  %23 = sbr.rel (!%p21_p2) target bundleno = 8 (0x8), region = 101 }
 0x34c   :  { %1258 = vsyncpa [#allocation3], 1 }
 0x34d   :  { %1260 = vsyncpa [#allocation3 + $0x1], 1 }
 0x34e   :  { %1261 = vsyncpa [#allocation6], 1 }
 0x34f   :  { %1262 = vsyncpa [#allocation4], 1 }
 0x350   :  { %1264 = vsyncpa [#allocation4 + $0x1], 1 }

</bundles_post_ra>
